<compile_context>
chip_gen: v5e
topology: v5e:2x2
jax: 0.10.0
libtpu: 0.0.40
codegen_flags: <defaults>
</compile_context>

<pallas_src>
import math

import jax
import jax.numpy as jnp
from jax.experimental import pallas as pl
from jax.experimental.pallas import tpu as pltpu


# Per-grid-step output-tile byte budget.  8 MiB double-buffers to 16 MiB,
# comfortably under the 32 MiB VMEM limit requested below on every generation
# (v5e/v6e: 128 MiB physical; v7x: 64 MiB physical / 32 MiB scoped default).
_TILE_BYTES = 8 * 1024 * 1024
_VMEM_LIMIT_BYTES = 32 * 1024 * 1024


def _scalar_embed_kernel(x_ref, w_ref, b_ref, o_ref):
    # x_ref: (TB, k), w_ref: (k, TE), b_ref: (1, TE), o_ref: (TB, TE)
    if x_ref.shape[-1] == 1:
        # Rank-1 outer product + bias: keep it on the VPU, never the MXU.
        # f32 inputs stay f32; bf16 inputs compute natively in bf16.
        # TODO(synk): force f32 compute for bf16 inputs on v5e (no bf16 VPU).
        out = x_ref[...] * w_ref[...] + b_ref[...]
    else:
        # Lane-dense folded path: w block is a slice of the block-diagonal
        # (k, k*E) weight -> tiny MXU matmul (f32 accumulate) realises the
        # per-group broadcast.  Work is negligible vs. the output DMA.
        out = jnp.dot(x_ref[...], w_ref[...],
                      preferred_element_type=jnp.float32,
                      precision=jax.lax.Precision.HIGHEST) + b_ref[...]
    o_ref[...] = out.astype(o_ref.dtype)


def _round_up(x: int, m: int) -> int:
    return ((x + m - 1) // m) * m


def _pick_fold(B: int, E: int) -> int:
    """k batch rows folded per lane row so the output last dim (k*E) is a
    multiple of 128 (unmasked lane-dense stores).  k must divide B; k == 1
    means no fold (already aligned, or the masked-store fallback)."""
    if E % 128 == 0:
        return 1
    base = math.lcm(E, 128) // E
    if B % base != 0:
        return 1                       # correct fallback (masked stores)
    k = base
    while k * 2 * E <= 2048 and B % (k * 2) == 0:
        k *= 2                         # widen lane rows while B allows
    return k


def _select_tiles(bf: int, ef: int, itemsize: int) -> tuple[int, int]:
    """Pick (tb, te): lane/sublane aligned, byte-budget bound, ragged tails
    allowed via pl.cdiv (never a huge full-extent fallback)."""
    # Prefer full-width rows: contiguous HBM writeback, weight/bias DMA'd
    # exactly once, and the E grid axis collapses.
    if ef % 128 != 0 or 8 * ef * itemsize <= _TILE_BYTES:
        te = ef
    else:
        te = max(128, (_TILE_BYTES // (8 * itemsize)) // 128 * 128)
    rows = max(8, (_TILE_BYTES // (te * itemsize)) // 8 * 8)
    tb = bf if bf <= rows else rows
    # v7x megacore: avoid a single-step grid over B when B is big enough to
    # split (no-op on single-TC v5e/v6e).
    if te == ef and tb == bf and bf >= 16:
        tb = _round_up(pl.cdiv(bf, 2), 8)
    return tb, te


def scalar_to_embedding(x, weight, bias):
    """Pallas equivalent of ScalarToEmbedding.forward.

    x: (B,); weight: (E, 1) (PyTorch nn.Linear layout); bias: (E,).
    Returns (B, E), matching nn.Linear(1, E)(x.unsqueeze(1))."""
    B = x.shape[0]
    E = weight.shape[0]
    out_dtype = x.dtype
    itemsize = jnp.dtype(out_dtype).itemsize

    w_row = weight.reshape(1, E)
    b_row = bias.reshape(1, E)

    k = _pick_fold(B, E)
    if k == 1:
        bf, ef = B, E
        x2 = x.reshape(B, 1)                                    # (B, 1)
        w2 = w_row                                              # (1, E)
        b2 = b_row                                              # (1, E)
    else:
        # Fold k batch rows per lane row: compute as (B//k, k*E), reshape back
        # for free (row-major contiguous, same element order).
        bf, ef = B // k, k * E
        x2 = x.reshape(bf, k)                                   # (B//k, k)
        w2 = jnp.kron(jnp.eye(k, dtype=weight.dtype), w_row)    # (k, k*E) block-diag
        b2 = jnp.tile(b_row, (1, k))                            # (1, k*E)

    tb, te = _select_tiles(bf, ef, itemsize)
    n_e = pl.cdiv(ef, te)
    n_b = pl.cdiv(bf, tb)
    grid = (n_e, n_b)          # B innermost -> weight/bias blocks stay resident

    cost = pl.CostEstimate(
        flops=2 * bf * k * ef,
        transcendentals=0,
        bytes_accessed=(B * E * itemsize                                   # output
                        + n_e * bf * k * jnp.dtype(x.dtype).itemsize       # x re-read per E tile
                        + k * ef * jnp.dtype(weight.dtype).itemsize        # weight once
                        + ef * jnp.dtype(bias.dtype).itemsize),            # bias once
    )

    out = pl.pallas_call(
        _scalar_embed_kernel,
        out_shape=jax.ShapeDtypeStruct((bf, ef), out_dtype),
        grid_spec=pltpu.PrefetchScalarGridSpec(
            num_scalar_prefetch=0,
            grid=grid,
            in_specs=[
                pl.BlockSpec((tb, k), lambda j, i: (i, 0)),   # x rides B
                pl.BlockSpec((k, te), lambda j, i: (0, j)),   # weight: resident over B steps
                pl.BlockSpec((1, te), lambda j, i: (0, j)),   # bias:   resident over B steps
            ],
            out_specs=pl.BlockSpec((tb, te), lambda j, i: (i, j)),
        ),
        compiler_params=pltpu.CompilerParams(
            dimension_semantics=("parallel", "parallel"),
            vmem_limit_bytes=_VMEM_LIMIT_BYTES,
        ),
        cost_estimate=cost,
    )(x2, w2, b2)

    return out.reshape(B, E)


def _reference(x, weight, bias):
    return x[:, None] @ weight.T + bias[None, :]


if __name__ == "__main__":
    key = jax.random.PRNGKey(0)
    k_x, k_w, k_b, k_x2, k_x3 = jax.random.split(key, 5)

    # --- Small case (module's intended usage): E=32 -> lane-dense folded path
    embed_size, batch = 32, 8
    weight = jax.random.normal(k_w, (embed_size, 1), dtype=jnp.float32) * 0.5
    bias = jax.random.normal(k_b, (embed_size,), dtype=jnp.float32) * 0.1
    x = jax.random.normal(k_x, (batch,), dtype=jnp.float32)

    out = jax.block_until_ready(scalar_to_embedding(x, weight, bias))
    ref = _reference(x, weight, bias)
    assert out.shape == (batch, embed_size)
    assert jnp.allclose(out, ref, atol=1e-4, rtol=1e-4), "mismatch (folded path)"

    # --- Aligned case (E % 128 == 0): rank-1 VPU path, split B grid ----------
    B2, E2 = 1024, 256
    w2 = jax.random.normal(k_w, (E2, 1), dtype=jnp.float32) * 0.5
    b2 = jax.random.normal(k_b, (E2,), dtype=jnp.float32) * 0.1
    x2 = jax.random.normal(k_x2, (B2,), dtype=jnp.float32)

    out2 = jax.block_until_ready(scalar_to_embedding(x2, w2, b2))
    ref2 = _reference(x2, w2, b2)
    assert out2.shape == (B2, E2)
    assert jnp.allclose(out2, ref2, atol=1e-4, rtol=1e-4), "mismatch (aligned path)"

    # --- Misaligned fallback (no legal fold: B=6, E=48) ----------------------
    B3, E3 = 6, 48
    w3 = jax.random.normal(k_w, (E3, 1), dtype=jnp.float32) * 0.5
    b3 = jax.random.normal(k_b, (E3,), dtype=jnp.float32) * 0.1
    x3 = jax.random.normal(k_x3, (B3,), dtype=jnp.float32)

    out3 = jax.block_until_ready(scalar_to_embedding(x3, w3, b3))
    ref3 = _reference(x3, w3, b3)
    assert out3.shape == (B3, E3)
    assert jnp.allclose(out3, ref3, atol=1e-4, rtol=1e-4), "mismatch (fallback path)"

    print("KERNEL_OK")
</pallas_src>

<mosaic_0001>
module attributes {stable_mosaic.version = 11 : i64} {
  func.func @_scalar_embed_kernel(%arg0: i32, %arg1: i32, %arg2: memref<1x8xf32, #tpu.memory_space<vmem>>, %arg3: memref<8x256xf32, #tpu.memory_space<vmem>>, %arg4: memref<1x256xf32, #tpu.memory_space<vmem>>, %arg5: memref<1x256xf32, #tpu.memory_space<vmem>>) attributes {dimension_semantics = [#tpu.dimension_semantics<parallel>, #tpu.dimension_semantics<parallel>], iteration_bounds = array<i64: 1, 1>, scalar_prefetch = 0 : i64, scratch_operands = 0 : i64, tpu.core_type = #tpu.core_type<tc>, window_params = [{transform_indices = @transform_0, window_bounds = array<i64: 1, 8>}, {transform_indices = @transform_1, window_bounds = array<i64: 8, 256>}, {transform_indices = @transform_2, window_bounds = array<i64: 1, 256>}, {transform_indices = @transform_3, window_bounds = array<i64: 1, 256>}]} {
    %c0 = arith.constant 0 : index
    %c0_0 = arith.constant 0 : index
    %0 = vector.load %arg2[%c0, %c0_0] : memref<1x8xf32, #tpu.memory_space<vmem>>, vector<1x8xf32>
    %c0_1 = arith.constant 0 : index
    %c0_2 = arith.constant 0 : index
    %1 = vector.load %arg3[%c0_1, %c0_2] : memref<8x256xf32, #tpu.memory_space<vmem>>, vector<8x256xf32>
    %cst = arith.constant dense<0.000000e+00> : vector<1x256xf32>
    %2 = tpu.matmul %0, %1, %cst {dimension_numbers = #tpu.dot_dimension_numbers<[1], [0], [0], [1], [0, 0, 1, 1], [], []>, precision = #tpu.contract_precision<fp32>} : vector<1x8xf32>, vector<8x256xf32>, vector<1x256xf32> -> vector<1x256xf32>
    %c0_3 = arith.constant 0 : index
    %c0_4 = arith.constant 0 : index
    %3 = vector.load %arg4[%c0_3, %c0_4] : memref<1x256xf32, #tpu.memory_space<vmem>>, vector<1x256xf32>
    %4 = arith.addf %2, %3 : vector<1x256xf32>
    %c0_5 = arith.constant 0 : index
    %c0_6 = arith.constant 0 : index
    %5 = vector.load %arg5[%c0_5, %c0_6] : memref<1x256xf32, #tpu.memory_space<vmem>>, vector<1x256xf32>
    tpu.vector_store %arg5[%c0_5, %c0_6], %4 {strides = array<i32>} : memref<1x256xf32, #tpu.memory_space<vmem>>, vector<1x256xf32>,
    return
  }
  func.func @transform_0(%arg0: i32, %arg1: i32) -> (i32, i32) {
    %c0_i32 = arith.constant 0 : i32
    %c0_i32_0 = arith.constant 0 : i32
    return %arg1, %c0_i32 : i32, i32
  }
  func.func @transform_1(%arg0: i32, %arg1: i32) -> (i32, i32) {
    %c0_i32 = arith.constant 0 : i32
    %c0_i32_0 = arith.constant 0 : i32
    return %c0_i32, %arg0 : i32, i32
  }
  func.func @transform_2(%arg0: i32, %arg1: i32) -> (i32, i32) {
    %c0_i32 = arith.constant 0 : i32
    %c0_i32_0 = arith.constant 0 : i32
    return %c0_i32, %arg0 : i32, i32
  }
  func.func @transform_3(%arg0: i32, %arg1: i32) -> (i32, i32) {
    %c0_i32 = arith.constant 0 : i32
    return %arg1, %arg0 : i32, i32
  }
}

</mosaic_0001>

<bundles_post_ra>
// kernel: tpu_custom_call.1
= control target key start
LH: loop header
LB: loop body
LE: loop exit
PB: predicated region body
PF: predicated region fallthrough
CT: control target
= control target key end

     0   :  { %8 = vsyncpa [#allocation3], 0  ;;  %s532_s0 = inlined_call_operand.hbm [shape: f32[1,8], index: 0, kind: input, shape index: {}]   ;;  %s533_s1 = inlined_call_operand.hbm [shape: f32[8,256], index: 1, kind: input, shape index: {}]   ;;  %s534_s2 = inlined_call_operand.hbm [shape: f32[1,256], index: 2, kind: input, shape index: {}]   ;;  %s535_s3 = inlined_call_operand.hbm [shape: f32[1,256], index: 3, kind: output, shape index: {}]  }
   0x1   :  { %9 = vsyncpa [#allocation6], 0  ;;  %s27_s14 = sshll.u32 %s533_s1, 4  ;;  %s28_s14 = int_to_ptr.hbm [resolvable:$true] %s27_s14 }
   0x2   :  { %10 = vsyncpa [#allocation4], 0  ;;  %s496_s15 = smov [#allocation5]   ;;  %s16_s19 = sshll.u32 %s532_s0, 4  ;;  %s17_s19 = int_to_ptr.hbm [resolvable:$true] %s16_s19 }
   0x3   :  { %s29_s16 = sshll.u32 %s496_s15, 4  ;;  %s497_s20 = smov [#allocation2]   ;;  %s30_s16 = int_to_ptr.vmem [resolvable:$true] %s29_s16 }
   0x4   :  { %32 = dma.hbm_to_vmem [thread:$0]  %s28_s14, 256, %s30_s16, [#allocation6]  }
   0x5   :  { %s18_s21 = sshll.u32 %s497_s20, 4  ;;  %s38_s24 = sshll.u32 %s534_s2, 4  ;;  %s19_s21 = int_to_ptr.vmem [resolvable:$true] %s18_s21  ;;  %s39_s24 = int_to_ptr.hbm [resolvable:$true] %s38_s24 }
   0x6   :  { %21 = dma.hbm_to_vmem [thread:$0]  %s17_s19, 16, %s19_s21, [#allocation3]  }
   0x7   :  { %s498_s1 = smov [#allocation7]  }
   0x8   :  { %s40_s25 = sshll.u32 %s498_s1, 4  ;;  %s41_s25 = int_to_ptr.vmem [resolvable:$true] %s40_s25 }
   0x9   :  { %43 = dma.hbm_to_vmem [thread:$0]  %s39_s24, 32, %s41_s25, [#allocation6]  }
   0xa   :  { %490 = dma.done.wait [#allocation3], 16  }
   0xb   :  { %491 = vsyncadd [#allocation3], 4294967280 }
   0xc   :  { %492 = dma.done.wait [#allocation6], 288  }
   0xd   :  { %493 = vsyncadd [#allocation6], 4294967008  ;;  %vm65_vm0 = vcmask 64512   ;;  %v57_v0 = vld [vmem:[#allocation5] sm:$0xff]  ;;  %v56_v1 = vld [vmem:[#allocation2] sm:$0x1]  ;;  %v367_v44 = vlaneseq }
   0xe   :  { %v58_v2 = vld [vmem:[#allocation5 + $0x8] sm:$0xff]  ;;  %v84_v3 = vand.u32 4294901760, %v57_v0  ;;  %v67_v4 = vsel %vm65_vm0, %v56_v1, 0  ;;  %v59_v19 = vld [vmem:[#allocation7] sm:$0x3]  ;;  %s499_s0 = smov [#allocation8]  }
   0xf   :  { %v230_v5 = vand.u32 4294901760, %v58_v2  ;;  %v86_v6 = vand.u32 4294901760, %v67_v4  ;;  %v61_v22 = vperm.slane %v59_v19, 0  ;;  %v62_v26 = vperm.slane %v59_v19, 1  ;;  %s377_s2 = sshll.u32 %s499_s0, 4  ;;  %s379_s28 = sshll.u32 %s535_s3, 4  ;;  %s378_s2 = int_to_ptr.vmem [resolvable:$true] %s377_s2  ;;  %s380_s28 = int_to_ptr.hbm [resolvable:$true] %s379_s28 }
  0x10   :  { %v111_v7 = vsub.f32 %v57_v0, %v84_v3  ;;  %85 = vmatpush.msra.mxu0 %v84_v3  ;;  %161 = vmatpush.msra.mxu3 %v84_v3  ;;  %vm364_vm1 = vcmask 1040384   ;;  %vm369_vm2 = vcmp.lt.s32.totalorder %v367_v44, 256 }
  0x11   :  { %v257_v8 = vsub.f32 %v58_v2, %v230_v5  ;;  %v87_v9 = vsub.f32 %v67_v4, %v86_v6 }
  0x12   :  { %138 = vmatpush.msra.mxu2 %v111_v7  ;;  %v112_v10 = vand.u32 4294901760, %v111_v7 }
  0x13   :  { %v258_v11 = vand.u32 4294901760, %v257_v8  ;;  %141 = vmatmul.f32.vlgmr.msra.gmra.mxu2 %v87_v9  ;;  %v88_v12 = vand.u32 4294901760, %v87_v9 }
  0x14   :  { %231 = vmatpush.msrb.mxu2 %v230_v5  ;;  %187 = vmatpush.msrb.mxu0 %v112_v10  ;;  %v113_v14 = vsub.f32 %v111_v7, %v112_v10 }
  0x15   :  { %v259_v13 = vsub.f32 %v257_v8, %v258_v11  ;;  %v89_v15 = vsub.f32 %v87_v9, %v88_v12  ;;  %165 = vmatmul.f32.vlgmr.msra.gmra.mxu3 %v88_v12 }
  0x16   :  { %333 = vmatpush.msra.mxu2 %v258_v11  ;;  %v114_v17 = vand.u32 4294901760, %v113_v14 }
  0x17   :  { %v260_v16 = vand.u32 4294901760, %v259_v13  ;;  %v90_v18 = vand.u32 4294901760, %v89_v15 }
  0x18   :  { %115 = vmatpush.msra.mxu1 %v114_v17 }
  0x19   :  { %261 = vmatpush.msrb.mxu3 %v260_v16  ;;  %91 = vmatmul.f32.vlgmr.msra.gmra.mxu0 %v90_v18 }
  0x1a   :  { %117 = vmatmul.f32.vlgmr.msra.gmra.mxu1 %v86_v6  ;;  %284 = vmatpush.msra.mxu0 %v257_v8 }
  0x1b   :  { %209 = vmatpush.msrb.mxu1 %v84_v3  ;;  %237 = vmatmul.f32.vlgmr.msrb.gmra.mxu2 %v90_v18 }
  0x1c   :  { %355 = vmatpush.msra.mxu3 %v230_v5 }
  0x1d   :  { %307 = vmatpush.msra.mxu1 %v230_v5  ;;  %263 = vmatmul.f32.vlgmr.msrb.gmra.mxu3 %v86_v6 }
  0x21   :  { %189 = vmatmul.f32.vlgmr.msrb.gmra.mxu0 %v86_v6 }
  0x22   :  { %211 = vmatmul.f32.vlgmr.msrb.gmra.mxu1 %v86_v6 }
  0x23   :  { %335 = vmatmul.f32.vlgmr.msra.gmra.mxu2 %v86_v6 }
  0x25   :  { %357 = vmatmul.f32.vlgmr.msra.gmra.mxu3 %v86_v6 }
  0x29   :  { %287 = vmatmul.f32.vlgmr.msra.gmra.mxu0 %v87_v9 }
  0x2a   :  { %311 = vmatmul.f32.vlgmr.msra.gmra.mxu1 %v88_v12 }
  0x96   :  { %v92_v20 = vpop.f32.mrf.mxu0  ;;  %v142_v23 = vpop.f32.mrf.mxu2 }
  0x97   :  { %v118_v21 = vpop.f32.mrf.mxu1  ;;  %v93_v25 = vadd.f32 %v92_v20, %v61_v22 }
  0x98   :  { %v166_v24 = vpop.f32.mrf.mxu3 }
  0x99   :  { %v119_v29 = vadd.f32 %v118_v21, %v93_v25 }
  0x9b   :  { %v143_v33 = vadd.f32 %v142_v23, %v119_v29 }
  0x9d   :  { %v167_v37 = vadd.f32 %v166_v24, %v143_v33 }
  0x9e   :  { %v190_v27 = vpop.f32.mrf.mxu0  ;;  %v238_v30 = vpop.f32.mrf.mxu2 }
  0x9f   :  { %v212_v28 = vpop.f32.mrf.mxu1  ;;  %v239_v31 = vadd.f32 %v238_v30, %v62_v26  ;;  %v191_v42 = vadd.f32 %v190_v27, %v167_v37 }
  0xa0   :  { %v264_v32 = vpop.f32.mrf.mxu3 }
  0xa1   :  { %v265_v34 = vadd.f32 %v264_v32, %v239_v31  ;;  %v213_v46 = vadd.f32 %v212_v28, %v191_v42 }
  0xa6   :  { %v288_v35 = vpop.f32.mrf.mxu0  ;;  %v336_v39 = vpop.f32.mrf.mxu2 }
  0xa7   :  { %v312_v36 = vpop.f32.mrf.mxu1  ;;  %v289_v38 = vadd.f32 %v288_v35, %v265_v34 }
  0xa8   :  { %v358_v41 = vpop.f32.mrf.mxu3 }
  0xa9   :  { %v313_v40 = vadd.f32 %v312_v36, %v289_v38 }
  0xab   :  { %v337_v43 = vadd.f32 %v336_v39, %v313_v40 }
  0xad   :  { %v359_v45 = vadd.f32 %v358_v41, %v337_v43 }
  0xaf   :  { %v363_v47 = vrot.slane %v359_v45, 7 }
  0xb1   :  { %v365_v48 = vsel %vm364_vm1, %v213_v46, %v363_v47 }
  0xb2   :  { %371 = vst.msk [vmem:[#allocation8] sm:$0x3] %vm369_vm2, %v365_v48 }
  0xb3   :  { %382 = dma.vmem_to_hbm [thread:$0]  %s378_s2, 32, %s380_s28, [#allocation4]  }
  0xb4   :  { %494 = dma.done.wait [#allocation4], 32  }
  0xb5   :  { %495 = vsyncadd [#allocation4], 4294967264 }
  0xb6   :  { %387 = vsyncpa [#allocation3], 1 }
  0xb7   :  { %388 = vsyncpa [#allocation6], 1 }
  0xb8   :  { %389 = vsyncpa [#allocation4], 1 }

</bundles_post_ra>
